<compile_context>
chip_gen: v7x
topology: tpu7x:2x2x1
jax: 0.10.0
libtpu: 0.0.40
codegen_flags: <defaults>
</compile_context>

<pallas_src>
import math

import jax
import jax.numpy as jnp
from jax.experimental import pallas as pl
from jax.experimental.pallas import tpu as pltpu


def _identity_head_kernel_2d(x_ref, o_ref):
    # x_ref: (row_tile, 128) -- only the first 128-lane slab of the flattened
    # spatial axis was DMA'd; the wanted element (h=0, w=0) is lane 0.
    o_ref[...] = x_ref[:, 0:1]


def _identity_head_kernel_3d(x_ref, o_ref):
    # x_ref: (row_tile, h_tile, W); o_ref: (row_tile, 1, 1).
    # Slices only (no squeezes) so the load/store layouts match trivially.
    o_ref[...] = x_ref[:, 0:1, 0:1]


# Per-input-block VMEM budget (bytes). Pallas double-buffers each input, so the
# footprint is ~2x this. 4 MiB stays far below the default scoped VMEM limits
# (16 MiB v5e, 32 MiB v6e/v7x) and v7x's 64 MiB physical VMEM while keeping
# tiles large enough to sit near the HBM roofline.
_VMEM_BLOCK_BUDGET_BYTES = 4 * 1024 * 1024


def _pick_row_tile(rows, per_row_bytes):
    """Largest row tile fitting the VMEM budget; multiple of 8 when tiled."""
    max_rows = max(8, _VMEM_BLOCK_BUDGET_BYTES // max(per_row_bytes, 1))
    if rows <= max_rows:
        return rows                 # full row extent: always a legal block dim
    return (max_rows // 8) * 8      # multiple of 8: legal sublane block dim


def identity_head(features):
    """Equivalent of IdentityHead.forward: features[..., 0, 0]."""
    *lead, H, W = features.shape
    lead = tuple(lead)
    rows = int(math.prod(lead)) if lead else 1
    hw = H * W
    dtype_bytes = jnp.dtype(features.dtype).itemsize

    if hw % 128 == 0:
        # Fetch only the first 128-lane slab of the flattened spatial axis.
        lane_tile = 128
        x = features.reshape(rows, hw)
        row_tile = _pick_row_tile(rows, lane_tile * dtype_bytes)
        in_spec = pl.BlockSpec((row_tile, lane_tile), lambda i: (i, 0))
        out_shape = jax.ShapeDtypeStruct((rows, 1), features.dtype)
        out_spec = pl.BlockSpec((row_tile, 1), lambda i: (i, 0))
        kernel = _identity_head_kernel_2d
    else:
        # Awkward spatial size: fetch only the first min(8, H) rows of H with
        # the full W lane extent.
        h_tile = H if H < 8 else 8
        x = features.reshape(rows, H, W)
        row_tile = _pick_row_tile(rows, h_tile * W * dtype_bytes)
        in_spec = pl.BlockSpec((row_tile, h_tile, W), lambda i: (i, 0, 0))
        out_shape = jax.ShapeDtypeStruct((rows, 1, 1), features.dtype)
        out_spec = pl.BlockSpec((row_tile, 1, 1), lambda i: (i, 0, 0))
        kernel = _identity_head_kernel_3d

    out = pl.pallas_call(
        kernel,
        out_shape=out_shape,
        grid=(pl.cdiv(rows, row_tile),),
        in_specs=[in_spec],
        out_specs=out_spec,
        compiler_params=pltpu.CompilerParams(
            dimension_semantics=("parallel",),
        ),
    )(x)

    return out.reshape(lead)


if __name__ == "__main__":
    key = jax.random.PRNGKey(0)

    # Primary case: NCHW features, batch=2, channels=4, spatial=16x16
    # (H*W = 256 is a multiple of 128 -> 2-D 128-lane-slab path).
    x = jax.random.normal(key, (2, 4, 16, 16), dtype=jnp.float32)
    y = jax.block_until_ready(identity_head(x))
    y_ref = x[..., 0, 0]
    assert y.shape == (2, 4), y.shape
    assert jnp.array_equal(y, y_ref), "mismatch vs reference (2D path)"

    # Awkward spatial size (H*W not a multiple of 128) exercises the 3-D path.
    x2 = jax.random.normal(jax.random.PRNGKey(0), (2, 3, 7, 9), dtype=jnp.float32)
    y2 = jax.block_until_ready(identity_head(x2))
    assert y2.shape == (2, 3), y2.shape
    assert jnp.array_equal(y2, x2[..., 0, 0]), "mismatch vs reference (3D path)"

    print("KERNEL_OK")
</pallas_src>

<mosaic_0001>
module attributes {stable_mosaic.version = 11 : i64} {
  func.func @_identity_head_kernel_2d(%arg0: i32, %arg1: memref<8x128xf32, #tpu.memory_space<vmem>>, %arg2: memref<8x1xf32, #tpu.memory_space<vmem>>) attributes {dimension_semantics = [#tpu.dimension_semantics<parallel>], iteration_bounds = array<i64: 1>, scalar_prefetch = 0 : i64, scratch_operands = 0 : i64, tpu.core_type = #tpu.core_type<tc>, window_params = [{transform_indices = @transform_0, window_bounds = array<i64: 8, 128>}, {transform_indices = @transform_1, window_bounds = array<i64: 8, 1>}]} {
    %c0 = arith.constant 0 : index
    %c0_0 = arith.constant 0 : index
    %0 = vector.load %arg1[%c0, %c0_0] : memref<8x128xf32, #tpu.memory_space<vmem>>, vector<8x1xf32>
    %c0_1 = arith.constant 0 : index
    %c0_2 = arith.constant 0 : index
    %1 = vector.load %arg2[%c0_1, %c0_2] : memref<8x1xf32, #tpu.memory_space<vmem>>, vector<8x1xf32>
    tpu.vector_store %arg2[%c0_1, %c0_2], %0 {strides = array<i32>} : memref<8x1xf32, #tpu.memory_space<vmem>>, vector<8x1xf32>,
    return
  }
  func.func @transform_0(%arg0: i32) -> (i32, i32) {
    %c0_i32 = arith.constant 0 : i32
    %c0_i32_0 = arith.constant 0 : i32
    return %arg0, %c0_i32 : i32, i32
  }
  func.func @transform_1(%arg0: i32) -> (i32, i32) {
    %c0_i32 = arith.constant 0 : i32
    %c0_i32_0 = arith.constant 0 : i32
    return %arg0, %c0_i32 : i32, i32
  }
}

</mosaic_0001>

<bundles_post_ra>
// kernel: tpu_custom_call.1
= control target key start
LH: loop header
LB: loop body
LE: loop exit
PB: predicated region body
PF: predicated region fallthrough
CT: control target
= control target key end

     0   :  { %6 = vsyncpa [#allocation3], 0  ;;  %s53_s6 = smov [#allocation2]   ;;  %s82_s0 = inlined_call_operand.hbm [shape: f32[8,256], index: 0, kind: input, shape index: {}]   ;;  %s83_s1 = inlined_call_operand.vmem [shape: f32[8,1], index: 1, kind: output, shape index: {}]  }
   0x1   :  { %s13_s7 = sshll.u32 %s53_s6, 4  ;;  %s29_s10 = scalar_lea.hbm %s82_s0, 128  ;;  %s14_s7 = int_to_ptr.vmem [resolvable:$true] %s13_s7 }
   0x2   :  { %p30_p0 = scmp.ne.s32.totalorder %s82_s0, %s29_s10  ;;  %s31_s15 = scalar_lea.hbm %s82_s0, 256 }
   0x3   :  { %p32_p1 = scmp.lt.u32.totalorder %s31_s15, %s29_s10  ;;  %p33_p2 = scmp.lt.u32.totalorder %s29_s10, %s82_s0 }
   0x5   :  { %p34_p3 = por %p33_p2, %p32_p1 }
   0x7   :  { %p35_p4 = pnand %p34_p3, %p30_p0 }
   0x9   :  { %38 = shalt.err (!%p35_p4)
}
   0xa   :  { %s39_s18 = scalar_lea.vmem %s14_s7, 128  ;;  %p44_p6 = scmp.lt.s32.totalorder %s14_s7, %s14_s7 }
   0xb   :  { %p40_p5 = scmp.ne.s32.totalorder %s14_s7, %s39_s18  ;;  %p45_p7 = scmp.lt.s32.totalorder %s39_s18, %s39_s18 }
   0xd   :  { %p46_p8 = por %p45_p7, %p44_p6 }
   0xf   :  { %p47_p9 = pnand %p46_p8, %p40_p5 }
  0x11   :  { %50 = shalt.err (!%p47_p9)
}
  0x12   :  { %16 = dma.hbm_to_vmem [thread:$0]  %s82_s0, 128, %s14_s7, [#allocation3]  }
  0x13   :  { %51 = dma.done.wait [#allocation3], 128  }
  0x14   :  { %52 = vsyncadd [#allocation3], 4294967168  ;;  %vm21_vm0 = vcmask 7168   ;;  %v20_v0 = vld [vmem:[#allocation2] sm:$0xff] }
  0x15   :  { %22 = vst.msk [vmem:[%s83_s1] sm:$0xff] %vm21_vm0, %v20_v0 }
  0x16   :  { %27 = vsyncpa [#allocation3], 1 }

</bundles_post_ra>
